<compile_context>
chip_gen: v7x
topology: tpu7x:2x2x1
jax: 0.10.0
libtpu: 0.0.40
codegen_flags: <defaults>
</compile_context>

<pallas_src>
import numpy as np
import jax
import jax.numpy as jnp
from jax.experimental import pallas as pl
from jax.experimental.pallas import tpu as pltpu


def _round_up(x, m):
    return (x + m - 1) // m * m


# ---------------------------------------------------------------------------
# Kernel 1: fused projection + attention-score columns.
#   h_ref  : (TR, IP)  bf16
#   w_ref  : (IP, OP+128) bf16   cols [0:out_dim]=W, col OP = W@a_src, OP+1 = W@a_dst
#   z_ref  : (TR, OP)  bf16      projected features
#   s_ref  : (TR, 128) f32       col 0 = src score, col 1 = dst score (f32!)
# ---------------------------------------------------------------------------
def _proj_kernel(h_ref, w_ref, z_ref, s_ref):
    zfull = jnp.dot(h_ref[...], w_ref[...], preferred_element_type=jnp.float32)
    op = z_ref.shape[1]
    z_ref[...] = zfull[:, :op].astype(z_ref.dtype)
    s_ref[...] = zfull[:, op:]


# ---------------------------------------------------------------------------
# Kernel 2: block-sparse masked softmax + aggregation (online softmax).
# Grid = (dst tiles, max non-empty src blocks per dst tile).
# ---------------------------------------------------------------------------
def _attn_kernel(tab_ref, cnt_ref,            # scalar-prefetch (SMEM)
                 sdst_ref, ssrc_ref, zs_ref, adj_ref,   # inputs
                 out_ref,                     # output (also the accumulator)
                 m_sc, l_sc):                 # scratch: running max / denom
    i = pl.program_id(0)
    j = pl.program_id(1)

    @pl.when(j == 0)
    def _init():
        m_sc[...] = jnp.full_like(m_sc, -1e30)
        l_sc[...] = jnp.zeros_like(l_sc)
        out_ref[...] = jnp.zeros_like(out_ref)

    @pl.when(j < cnt_ref[i])                  # skip padded (empty) src blocks
    def _compute():
        mask = adj_ref[...] != 0                              # (TM, TS) 0/1 edges
        e = sdst_ref[...] + ssrc_ref[...]                     # (TM,1)+(1,TS) f32 logits
        e = jnp.maximum(e, 0.01 * e)                          # leaky_relu (one VPU op)
        e = jnp.where(mask, e, -jnp.inf)                      # non-edges -> -inf

        m_prev = m_sc[...]
        m_new = jnp.maximum(m_prev, jnp.max(e, axis=1, keepdims=True))  # stays finite
        scale = jnp.exp(m_prev - m_new)
        p = jnp.exp(e - m_new)                                # exp(-inf)=0 on non-edges

        l_sc[...] = scale * l_sc[...] + jnp.sum(p, axis=1, keepdims=True)
        out_ref[...] = scale * out_ref[...] + jnp.dot(
            p.astype(jnp.bfloat16), zs_ref[...], preferred_element_type=jnp.float32)
        m_sc[...] = m_new

    @pl.when(j == pl.num_programs(1) - 1)
    def _finalize():
        # zero-in-degree rows (incl. padding rows) keep acc==0; clamp the denom
        denom = jnp.maximum(l_sc[...], jnp.float32(1e-20))
        out_ref[...] = out_ref[...] * pl.reciprocal(denom, approx=True)


# ---------------------------------------------------------------------------
# Wrapper
# ---------------------------------------------------------------------------
def gat_layer_forward(h, w, a, adj, *, dst_tile=512, src_tile=1024):
    """GAT layer forward.

    h   : (N, in_dim)  float32 node features
    w   : (in_dim, out_dim) float32 (transposed nn.Linear weight, z = h @ w)
    a   : (2, out_dim) float32; row 0 = src half, row 1 = dst half of attn_fc
    adj : (N, N) adjacency; adj[dst, src] != 0 iff edge src -> dst. Must be a
          concrete array (graph structure is static) - the block-sparsity
          table is computed eagerly in numpy.
    """
    N, in_dim = h.shape
    out_dim = w.shape[1]
    f32, bf16 = jnp.float32, jnp.bfloat16

    # --- lane-dense padded sizes -------------------------------------------
    IP = _round_up(in_dim, 128)                  # MXU contraction dim
    OP = _round_up(out_dim, 128)                 # feature lanes
    WP = OP + 128                                # + lane block for score columns
    N128 = _round_up(N, 128)
    TS = min(src_tile, N128)                     # src tile (lane dim of adj tiles)
    TM = min(dst_tile, N128)                     # dst tile
    N_pad = _round_up(N, int(np.lcm(TM, TS)))
    TR = 512 if N_pad % 512 == 0 else 128        # projection row tile

    # --- block-sparsity structure of the adjacency (eager, graph is static) -
    adj_np = np.zeros((N_pad, N_pad), np.int8)
    adj_np[:N, :N] = (np.asarray(adj) != 0)      # binarize: boolean edge mask
    nI, nJ = N_pad // TM, N_pad // TS
    nz = adj_np.reshape(nI, TM, nJ, TS).any(axis=(1, 3))        # (nI, nJ) non-empty?
    counts_np = nz.sum(axis=1).astype(np.int32)                 # per-dst-tile count
    max_cnt = max(int(counts_np.max()), 1)
    tab_np = np.zeros((nI, max_cnt), np.int32)
    for ii in range(nI):
        idx = np.flatnonzero(nz[ii])
        if idx.size:
            tab_np[ii, :idx.size] = idx
            tab_np[ii, idx.size:] = idx[-1]      # repeat last -> no redundant DMA
    tab = jnp.asarray(tab_np.reshape(-1))        # flat 1-D int32 SMEM table
    counts = jnp.asarray(counts_np)
    adj_p = jnp.asarray(adj_np)

    # --- parameter / input layout prep (built bf16, O(N*in + in*out)) -------
    wf = jnp.asarray(w, f32)
    af = jnp.asarray(a, f32)
    w_ext = jnp.zeros((IP, WP), f32)
    w_ext = w_ext.at[:in_dim, :out_dim].set(wf)
    w_ext = w_ext.at[:in_dim, OP].set(wf @ af[0])        # fused src-score column
    w_ext = w_ext.at[:in_dim, OP + 1].set(wf @ af[1])    # fused dst-score column
    w_ext = w_ext.astype(bf16)
    h_p = jnp.zeros((N_pad, IP), bf16).at[:N, :in_dim].set(h.astype(bf16))

    # --- kernel 1: projection + fused score columns -------------------------
    z, s = pl.pallas_call(
        _proj_kernel,
        out_shape=(jax.ShapeDtypeStruct((N_pad, OP), bf16),
                   jax.ShapeDtypeStruct((N_pad, 128), f32)),
        grid=(N_pad // TR,),
        in_specs=[pl.BlockSpec((TR, IP), lambda r: (r, 0)),
                  pl.BlockSpec((IP, WP), lambda r: (0, 0))],
        out_specs=[pl.BlockSpec((TR, OP), lambda r: (r, 0)),
                   pl.BlockSpec((TR, 128), lambda r: (r, 0))],
        compiler_params=pltpu.CompilerParams(dimension_semantics=("parallel",)),
    )(h_p, w_ext)

    s_src = s[:, 0].reshape(1, N_pad)    # (1, N_pad) f32, lane-dense src scores
    s_dst = s[:, 1:2]                    # (N_pad, 1) f32 dst scores

    # --- kernel 2: block-sparse masked softmax + aggregation ----------------
    out_p = pl.pallas_call(
        _attn_kernel,
        out_shape=jax.ShapeDtypeStruct((N_pad, OP), f32),
        grid_spec=pltpu.PrefetchScalarGridSpec(
            num_scalar_prefetch=2,                      # tab, counts -> SMEM
            grid=(nI, max_cnt),
            in_specs=[
                # dst scores: resident across the src axis
                pl.BlockSpec((TM, 1), lambda i, j, tab, cnt: (i, 0)),
                # src scores / src features / adjacency: block-sparse indexed
                pl.BlockSpec((1, TS),
                             lambda i, j, tab, cnt: (0, tab[i * max_cnt + j])),
                pl.BlockSpec((TS, OP),
                             lambda i, j, tab, cnt: (tab[i * max_cnt + j], 0)),
                pl.BlockSpec((TM, TS),
                             lambda i, j, tab, cnt: (i, tab[i * max_cnt + j])),
            ],
            out_specs=pl.BlockSpec((TM, OP), lambda i, j, tab, cnt: (i, 0)),
            scratch_shapes=[pltpu.VMEM((TM, 1), f32),    # running max
                            pltpu.VMEM((TM, 1), f32)]),  # running denom
        compiler_params=pltpu.CompilerParams(
            dimension_semantics=("parallel", "arbitrary"),
            vmem_limit_bytes=48 * 1024 * 1024),          # safe on v7x (64 MiB/TC)
    )(tab, counts, s_dst, s_src, z, adj_p)

    return out_p[:N, :out_dim]


# ---------------------------------------------------------------------------
# Pure-numpy f32 reference (PyTorch/DGL semantics)
# ---------------------------------------------------------------------------
def reference_forward(h, w, a, adj):
    z = h @ w
    e = (z @ a[1])[:, None] + (z @ a[0])[None, :]     # e[dst, src]
    e = np.where(e > 0, e, 0.01 * e)                  # leaky_relu
    e = np.where(adj > 0, e, -1e30)
    e = e - e.max(axis=1, keepdims=True)
    p = np.exp(e) * (adj > 0)
    alpha = p / p.sum(axis=1, keepdims=True)
    return alpha @ z


if __name__ == "__main__":
    # --- deterministic setup -------------------------------------------------
    N, in_dim, out_dim = 16, 8, 16
    key = jax.random.PRNGKey(0)
    k_h, k_w, k_a = jax.random.split(key, 3)

    h = jax.random.normal(k_h, (N, in_dim), dtype=jnp.float32)

    # Xavier-normal init with gain = calculate_gain('relu') = sqrt(2)
    gain = np.sqrt(2.0)
    std_fc = gain * np.sqrt(2.0 / (in_dim + out_dim))
    w_fc = std_fc * jax.random.normal(k_w, (out_dim, in_dim), dtype=jnp.float32)
    w = w_fc.T                                            # (in_dim, out_dim)
    std_attn = gain * np.sqrt(2.0 / (2 * out_dim + 1))
    a_flat = std_attn * jax.random.normal(k_a, (2 * out_dim,), dtype=jnp.float32)
    a = a_flat.reshape(2, out_dim)                        # row0: src, row1: dst

    # Word-chain graph (like build_graph): edges in both directions.
    adj_np = np.zeros((N, N), dtype=np.int8)
    for i in range(N - 1):
        adj_np[i + 1, i] = 1   # i -> i+1
        adj_np[i, i + 1] = 1   # i+1 -> i
    adj = jnp.asarray(adj_np)

    # --- run kernels ----------------------------------------------------------
    out = jax.block_until_ready(gat_layer_forward(h, w, a, adj))
    ref = reference_forward(np.asarray(h, np.float32), np.asarray(w, np.float32),
                            np.asarray(a, np.float32), adj_np.astype(np.float32))
    np.testing.assert_allclose(np.asarray(out), ref, rtol=5e-2, atol=5e-2)

    # --- second check: multi-tile chain graph exercises the block-sparse path
    N2 = 300
    h2 = jax.random.normal(jax.random.PRNGKey(1), (N2, in_dim), dtype=jnp.float32)
    adj2_np = np.zeros((N2, N2), dtype=np.int8)
    idx = np.arange(N2 - 1)
    adj2_np[idx + 1, idx] = 1
    adj2_np[idx, idx + 1] = 1
    out2 = jax.block_until_ready(
        gat_layer_forward(h2, w, a, jnp.asarray(adj2_np), dst_tile=128, src_tile=128))
    ref2 = reference_forward(np.asarray(h2, np.float32), np.asarray(w, np.float32),
                             np.asarray(a, np.float32), adj2_np.astype(np.float32))
    np.testing.assert_allclose(np.asarray(out2), ref2, rtol=5e-2, atol=5e-2)

    print("KERNEL_OK")
</pallas_src>

<mosaic_0001>
module attributes {stable_mosaic.version = 11 : i64} {
  func.func @_proj_kernel(%arg0: i32, %arg1: memref<128x128xbf16, #tpu.memory_space<vmem>>, %arg2: memref<128x256xbf16, #tpu.memory_space<vmem>>, %arg3: memref<128x128xbf16, #tpu.memory_space<vmem>>, %arg4: memref<128x128xf32, #tpu.memory_space<vmem>>) attributes {dimension_semantics = [#tpu.dimension_semantics<parallel>], iteration_bounds = array<i64: 1>, scalar_prefetch = 0 : i64, scratch_operands = 0 : i64, tpu.core_type = #tpu.core_type<tc>, window_params = [{transform_indices = @transform_0, window_bounds = array<i64: 128, 128>}, {pipeline_mode = #tpu.pipeline_mode<synchronous>, transform_indices = @transform_1, window_bounds = array<i64: 128, 256>}, {transform_indices = @transform_2, window_bounds = array<i64: 128, 128>}, {transform_indices = @transform_3, window_bounds = array<i64: 128, 128>}]} {
    %c0 = arith.constant 0 : index
    %c0_0 = arith.constant 0 : index
    %0 = vector.load %arg1[%c0, %c0_0] : memref<128x128xbf16, #tpu.memory_space<vmem>>, vector<128x128xbf16>
    %c0_1 = arith.constant 0 : index
    %c0_2 = arith.constant 0 : index
    %1 = vector.load %arg2[%c0_1, %c0_2] : memref<128x256xbf16, #tpu.memory_space<vmem>>, vector<128x256xbf16>
    %cst = arith.constant dense<0.000000e+00> : vector<128x256xf32>
    %2 = tpu.matmul %0, %1, %cst {dimension_numbers = #tpu.dot_dimension_numbers<[1], [0], [0], [1], [0, 0, 1, 1], [], []>} : vector<128x128xbf16>, vector<128x256xbf16>, vector<128x256xf32> -> vector<128x256xf32>
    %3 = vector.extract_strided_slice %2 {offsets = [0, 0], sizes = [128, 128], strides = [1, 1]} : vector<128x256xf32> to vector<128x128xf32>
    %4 = arith.truncf %3 : vector<128x128xf32> to vector<128x128xbf16>
    %c0_3 = arith.constant 0 : index
    %c0_4 = arith.constant 0 : index
    %5 = vector.load %arg3[%c0_3, %c0_4] : memref<128x128xbf16, #tpu.memory_space<vmem>>, vector<128x128xbf16>
    tpu.vector_store %arg3[%c0_3, %c0_4], %4 {strides = array<i32>} : memref<128x128xbf16, #tpu.memory_space<vmem>>, vector<128x128xbf16>,
    %6 = vector.extract_strided_slice %2 {offsets = [0, 128], sizes = [128, 128], strides = [1, 1]} : vector<128x256xf32> to vector<128x128xf32>
    %c0_5 = arith.constant 0 : index
    %c0_6 = arith.constant 0 : index
    %7 = vector.load %arg4[%c0_5, %c0_6] : memref<128x128xf32, #tpu.memory_space<vmem>>, vector<128x128xf32>
    tpu.vector_store %arg4[%c0_5, %c0_6], %6 {strides = array<i32>} : memref<128x128xf32, #tpu.memory_space<vmem>>, vector<128x128xf32>,
    return
  }
  func.func @transform_0(%arg0: i32) -> (i32, i32) {
    %c0_i32 = arith.constant 0 : i32
    %c0_i32_0 = arith.constant 0 : i32
    return %arg0, %c0_i32 : i32, i32
  }
  func.func @transform_1(%arg0: i32) -> (i32, i32) {
    %c0_i32 = arith.constant 0 : i32
    %c0_i32_0 = arith.constant 0 : i32
    %c0_i32_1 = arith.constant 0 : i32
    return %c0_i32, %c0_i32_0 : i32, i32
  }
  func.func @transform_2(%arg0: i32) -> (i32, i32) {
    %c0_i32 = arith.constant 0 : i32
    %c0_i32_0 = arith.constant 0 : i32
    return %arg0, %c0_i32 : i32, i32
  }
  func.func @transform_3(%arg0: i32) -> (i32, i32) {
    %c0_i32 = arith.constant 0 : i32
    %c0_i32_0 = arith.constant 0 : i32
    return %arg0, %c0_i32 : i32, i32
  }
}

</mosaic_0001>

<bundles_post_ra>
// kernel: tpu_custom_call.1
= control target key start
LH: loop header
LB: loop body
LE: loop exit
PB: predicated region body
PF: predicated region fallthrough
CT: control target
= control target key end

     0   :  { %9 = vsyncpa [#allocation3], 0  ;;  %s807_s0 = inlined_call_operand.hbm [shape: bf16[128,128], index: 0, kind: input, shape index: {}]   ;;  %s808_s1 = inlined_call_operand.hbm [shape: bf16[128,256], index: 1, kind: input, shape index: {}]   ;;  %s809_s2 = inlined_call_operand.hbm [shape: bf16[128,128], index: 2, kind: output, shape index: {0}]   ;;  %s810_s3 = inlined_call_operand.hbm [shape: f32[128,128], index: 3, kind: output, shape index: {1}]  }
   0x1   :  { %10 = vsyncpa [#allocation6], 0 }
   0x2   :  { %11 = vsyncpa [#allocation4], 0 }
   0x3   :  { %12 = vsyncpa [#allocation9], 0  ;;  %s703_s12 = smov [#allocation2]   ;;  %s607_s16 = scalar_lea.hbm %s807_s0, 1024 }
   0x4   :  { %s18_s13 = sshll.u32 %s703_s12, 4  ;;  %p608_p0 = scmp.ne.s32.totalorder %s807_s0, %s607_s16  ;;  %s19_s13 = int_to_ptr.vmem [resolvable:$true] %s18_s13 }
   0x5   :  { %p611_p1 = scmp.lt.u32.totalorder %s607_s16, %s807_s0 }
   0x7   :  { %p613_p2 = pnand %p611_p1, %p608_p0 }
   0x9   :  { %616 = shalt.err (!%p613_p2)
}
   0xa   :  { %s617_s21 = scalar_lea.vmem %s19_s13, 1024  ;;  %p622_p4 = scmp.lt.s32.totalorder %s19_s13, %s19_s13 }
   0xb   :  { %p618_p3 = scmp.ne.s32.totalorder %s19_s13, %s617_s21  ;;  %p623_p5 = scmp.lt.s32.totalorder %s617_s21, %s617_s21 }
   0xd   :  { %p624_p6 = por %p623_p5, %p622_p4 }
   0xf   :  { %p625_p7 = pnand %p624_p6, %p618_p3 }
  0x11   :  { %628 = shalt.err (!%p625_p7)
}
  0x12   :  { %s704_s22 = smov 64   ;;  %s705_s23 = smov 4  }
  0x13   :  { %24 = dma.hbm_to_vmem [thread:$0]  %s807_s0, 1024, %s19_s13, [#allocation3], %s704_s22, %s704_s22, %s705_s23  }
  0x14   :  { %s706_s26 = smov [#allocation5]   ;;  %s629_s30 = scalar_lea.hbm %s808_s1, 2048 }
  0x15   :  { %s30_s27 = sshll.u32 %s706_s26, 4  ;;  %p630_p8 = scmp.ne.s32.totalorder %s808_s1, %s629_s30  ;;  %s31_s27 = int_to_ptr.vmem [resolvable:$true] %s30_s27 }
  0x16   :  { %p633_p9 = scmp.lt.u32.totalorder %s629_s30, %s808_s1 }
  0x18   :  { %p635_p10 = pnand %p633_p9, %p630_p8 }
  0x1a   :  { %638 = shalt.err (!%p635_p10)
}
  0x1b   :  { %s639_s8 = scalar_lea.vmem %s31_s27, 2048  ;;  %p644_p12 = scmp.lt.s32.totalorder %s31_s27, %s31_s27 }
  0x1c   :  { %p640_p11 = scmp.ne.s32.totalorder %s31_s27, %s639_s8  ;;  %p645_p13 = scmp.lt.s32.totalorder %s639_s8, %s639_s8 }
  0x1e   :  { %p646_p0 = por %p645_p13, %p644_p12 }
  0x20   :  { %p647_p1 = pnand %p646_p0, %p640_p11 }
  0x22   :  { %650 = shalt.err (!%p647_p1)
}
  0x23   :  { %s707_s0 = smov 128   ;;  %s708_s9 = smov 8  }
  0x24   :  { %36 = dma.hbm_to_vmem [thread:$0]  %s808_s1, 2048, %s31_s27, [#allocation6], %s707_s0, %s707_s0, %s708_s9  }
  0x25   :  { %695 = dma.done.wait [#allocation3], 1024  }
  0x26   :  { %696 = vsyncadd [#allocation3], 4294966272 }
  0x27   :  { %697 = dma.done.wait [#allocation6], 2048  }
  0x28   :  { %698 = vsyncadd [#allocation6], 4294965248  ;;  %v709_v0 = vmov 0   ;;  %v575_v1 = vld [vmem:[#allocation5 + $0x4] ss:$8 sps:$4 sm:$0xff]   ;;  %v603_v21 = vld [vmem:[#allocation2 + $0x10] sm:$0xff]  }
  0x29   :  { %236 = vmatprep.mubr.bf16.mxu0 %v709_v0  ;;  %276 = vmatprep.mubr.bf16.mxu1 %v709_v0  ;;  %v577_v2 = vld [vmem:[#allocation5] ss:$8 sps:$4 sm:$0xff]   ;;  %v578_v3 = vld [vmem:[#allocation5 + $0x14] ss:$8 sps:$4 sm:$0xff]   ;;  %v580_v4 = vld [vmem:[#allocation5 + $0x10] ss:$8 sps:$4 sm:$0xff]  }
  0x2a   :  { %204 = vmatprep.subr.bf16.mxu0 %v575_v1  ;;  %550 = vmatprep.subr.bf16.mxu1 %v575_v1  ;;  %v581_v5 = vld [vmem:[#allocation5 + $0x24] ss:$8 sps:$4 sm:$0xff]   ;;  %v583_v6 = vld [vmem:[#allocation5 + $0x20] ss:$8 sps:$4 sm:$0xff]   ;;  %v584_v7 = vld [vmem:[#allocation5 + $0x34] ss:$8 sps:$4 sm:$0xff]  }
  0x2b   :  { %205 = vmatpush1.bf16.msra.mxu0 %v577_v2  ;;  %558 = vmatpush1.bf16.msra.mxu1 %v577_v2  ;;  %v586_v8 = vld [vmem:[#allocation5 + $0x30] ss:$8 sps:$4 sm:$0xff]   ;;  %v587_v9 = vld [vmem:[#allocation5 + $0x44] ss:$8 sps:$4 sm:$0xff]   ;;  %v589_v10 = vld [vmem:[#allocation5 + $0x40] ss:$8 sps:$4 sm:$0xff]  }
  0x2c   :  { %206 = vmatprep.subr.bf16.mxu0 %v578_v3  ;;  %551 = vmatprep.subr.bf16.mxu1 %v578_v3  ;;  %v590_v11 = vld [vmem:[#allocation5 + $0x54] ss:$8 sps:$4 sm:$0xff]   ;;  %v592_v12 = vld [vmem:[#allocation5 + $0x50] ss:$8 sps:$4 sm:$0xff]   ;;  %v593_v13 = vld [vmem:[#allocation5 + $0x64] ss:$8 sps:$4 sm:$0xff]  }
  0x2d   :  { %v595_v14 = vld [vmem:[#allocation5 + $0x60] ss:$8 sps:$4 sm:$0xff]   ;;  %v596_v15 = vld [vmem:[#allocation5 + $0x74] ss:$8 sps:$4 sm:$0xff]   ;;  %v598_v16 = vld [vmem:[#allocation5 + $0x70] ss:$8 sps:$4 sm:$0xff]  }
  0x2e   :  { %v599_v17 = vld [vmem:[#allocation2] sm:$0xff]   ;;  %v601_v19 = vld [vmem:[#allocation2 + $0x8] sm:$0xff]   ;;  %v604_v22 = vld [vmem:[#allocation2 + $0x30] sm:$0xff]   ;;  %s710_s1 = smov [#allocation8]   ;;  %s711_s13 = smov [#allocation7]  }
  0x2f   :  { %207 = vmatpush1.bf16.msra.mxu0 %v580_v4  ;;  %559 = vmatpush1.bf16.msra.mxu1 %v580_v4  ;;  %v600_v18 = vld [vmem:[#allocation2 + $0x20] sm:$0xff]   ;;  %v602_v20 = vld [vmem:[#allocation2 + $0x28] sm:$0xff]   ;;  %v605_v23 = vld [vmem:[#allocation2 + $0x18] sm:$0xff]   ;;  %s430_s12 = sshll.u32 %s710_s1, 4  ;;  %s418_s14 = sshll.u32 %s711_s13, 4  ;;  %s431_s12 = int_to_ptr.vmem [resolvable:$true] %s430_s12  ;;  %s770_s14 = int_to_ptr.vmem [resolvable:$true] %s418_s14 }
  0x30   :  { %208 = vmatprep.subr.bf16.mxu0 %v581_v5  ;;  %552 = vmatprep.subr.bf16.mxu1 %v581_v5  ;;  %v606_v24 = vld [vmem:[#allocation2 + $0x38] sm:$0xff]   ;;  %s651_s15 = scalar_lea.vmem %s431_s12, 2048  ;;  %p656_p3 = scmp.lt.s32.totalorder %s431_s12, %s431_s12 }
  0x31   :  { %p652_p2 = scmp.ne.s32.totalorder %s431_s12, %s651_s15  ;;  %p657_p4 = scmp.lt.s32.totalorder %s651_s15, %s651_s15 }
  0x33   :  { %209 = vmatpush1.bf16.msra.mxu0 %v583_v6  ;;  %560 = vmatpush1.bf16.msra.mxu1 %v583_v6  ;;  %p658_p5 = por %p657_p4, %p656_p3 }
  0x34   :  { %210 = vmatprep.subr.bf16.mxu0 %v584_v7  ;;  %553 = vmatprep.subr.bf16.mxu1 %v584_v7 }
  0x35   :  { %p659_p6 = pnand %p658_p5, %p652_p2 }
  0x37   :  { %211 = vmatpush1.bf16.msra.mxu0 %v586_v8  ;;  %561 = vmatpush1.bf16.msra.mxu1 %v586_v8 }
  0x38   :  { %212 = vmatprep.subr.bf16.mxu0 %v587_v9  ;;  %554 = vmatprep.subr.bf16.mxu1 %v587_v9 }
  0x3b   :  { %213 = vmatpush1.bf16.msra.mxu0 %v589_v10  ;;  %562 = vmatpush1.bf16.msra.mxu1 %v589_v10 }
  0x3c   :  { %214 = vmatprep.subr.bf16.mxu0 %v590_v11  ;;  %555 = vmatprep.subr.bf16.mxu1 %v590_v11 }
  0x3f   :  { %215 = vmatpush1.bf16.msra.mxu0 %v592_v12  ;;  %563 = vmatpush1.bf16.msra.mxu1 %v592_v12 }
  0x40   :  { %216 = vmatprep.subr.bf16.mxu0 %v593_v13  ;;  %556 = vmatprep.subr.bf16.mxu1 %v593_v13 }
  0x43   :  { %217 = vmatpush1.bf16.msra.mxu0 %v595_v14  ;;  %564 = vmatpush1.bf16.msra.mxu1 %v595_v14 }
  0x44   :  { %218 = vmatprep.subr.bf16.mxu0 %v596_v15  ;;  %557 = vmatprep.subr.bf16.mxu1 %v596_v15 }
  0x47   :  { %219 = vmatpush1.bf16.msra.mxu0 %v598_v16  ;;  %565 = vmatpush1.bf16.msra.mxu1 %v598_v16 }
  0x4a   :  { %237 = vmatmul.mubr.bf16.vlgmr.msra.gmra.mrb[0].mxu0 %v599_v17  ;;  %277 = vmatmul.mubr.bf16.vlgmr.msra.gmra.mrb[0].mxu1 %v600_v18 }
  0x4b   :  { %246 = vmatprep.mubr.bf16.mxu0 %v709_v0  ;;  %286 = vmatprep.mubr.bf16.mxu1 %v709_v0 }
  0x52   :  { %247 = vmatmul.mubr.bf16.gmra.mrb[4].mxu0 %v601_v19  ;;  %287 = vmatmul.mubr.bf16.gmra.mrb[4].mxu1 %v602_v20 }
  0x53   :  { %256 = vmatprep.mubr.bf16.mxu0 %v709_v0  ;;  %296 = vmatprep.mubr.bf16.mxu1 %v709_v0 }
  0x5a   :  { %257 = vmatmul.mubr.bf16.gmra.mrb[8].mxu0 %v603_v21  ;;  %297 = vmatmul.mubr.bf16.gmra.mrb[8].mxu1 %v604_v22 }
  0x5b   :  { %266 = vmatprep.mubr.bf16.mxu0 %v709_v0  ;;  %306 = vmatprep.mubr.bf16.mxu1 %v709_v0 }
  0x62   :  { %267 = vmatmul.mubr.bf16.gmra.mrb[12].mxu0 %v605_v23  ;;  %307 = vmatmul.mubr.bf16.gmra.mrb[12].mxu1 %v606_v24 }
 0x11d   :  { %v238_v25 = vpop.f32.mrb[0].mxu0  ;;  %v278_v26 = vpop.f32.mrb[0].mxu1 }
 0x11e   :  { %v240_v27 = vpop.f32.mrb[1].mxu0  ;;  %v280_v28 = vpop.f32.mrb[1].mxu1 }
 0x11f   :  { %397 = vst [vmem:[#allocation8] sm:$0xff] %v240_v27  ;;  %405 = vst [vmem:[#allocation8 + $0x40] sm:$0xff] %v280_v28  ;;  %v242_v29 = vpop.f32.mrb[2].mxu0  ;;  %v282_v30 = vpop.f32.mrb[2].mxu1 }
 0x120   :  { %v506_v31 = vpack.c.bf16 %v242_v29, %v238_v25  ;;  %v526_v32 = vpack.c.bf16 %v282_v30, %v278_v26  ;;  %v244_v33 = vpop.f32.mrb[3].mxu0  ;;  %v284_v34 = vpop.f32.mrb[3].mxu1 }
 0x121   :  { %398 = vst [vmem:[#allocation8 + $0x8] sm:$0xff] %v244_v33  ;;  %406 = vst [vmem:[#allocation8 + $0x48] sm:$0xff] %v284_v34 }
 0x122   :  { %507 = vst [vmem:[#allocation7] sm:$0xff] %v506_v31   ;;  %546 = vst [vmem:[#allocation7 + $0x20] sm:$0xff] %v526_v32  }
 0x125   :  { %v248_v35 = vpop.f32.mrb[4].mxu0  ;;  %v288_v36 = vpop.f32.mrb[4].mxu1 }
 0x126   :  { %v250_v37 = vpop.f32.mrb[5].mxu0  ;;  %v290_v38 = vpop.f32.mrb[5].mxu1 }
 0x127   :  { %399 = vst [vmem:[#allocation8 + $0x10] sm:$0xff] %v250_v37  ;;  %407 = vst [vmem:[#allocation8 + $0x50] sm:$0xff] %v290_v38  ;;  %v252_v39 = vpop.f32.mrb[6].mxu0  ;;  %v292_v40 = vpop.f32.mrb[6].mxu1 }
 0x128   :  { %v511_v41 = vpack.c.bf16 %v252_v39, %v248_v35  ;;  %v531_v42 = vpack.c.bf16 %v292_v40, %v288_v36  ;;  %v254_v43 = vpop.f32.mrb[7].mxu0  ;;  %v294_v44 = vpop.f32.mrb[7].mxu1 }
 0x129   :  { %400 = vst [vmem:[#allocation8 + $0x18] sm:$0xff] %v254_v43  ;;  %408 = vst [vmem:[#allocation8 + $0x58] sm:$0xff] %v294_v44 }
 0x12a   :  { %543 = vst [vmem:[#allocation7 + $0x8] sm:$0xff] %v511_v41   ;;  %547 = vst [vmem:[#allocation7 + $0x28] sm:$0xff] %v531_v42  }
 0x12d   :  { %v258_v45 = vpop.f32.mrb[8].mxu0  ;;  %v298_v46 = vpop.f32.mrb[8].mxu1 }
 0x12e   :  { %v260_v47 = vpop.f32.mrb[9].mxu0  ;;  %v300_v48 = vpop.f32.mrb[9].mxu1 }
 0x12f   :  { %401 = vst [vmem:[#allocation8 + $0x20] sm:$0xff] %v260_v47  ;;  %409 = vst [vmem:[#allocation8 + $0x60] sm:$0xff] %v300_v48  ;;  %v262_v49 = vpop.f32.mrb[10].mxu0  ;;  %v302_v50 = vpop.f32.mrb[10].mxu1 }
 0x130   :  { %v516_v51 = vpack.c.bf16 %v262_v49, %v258_v45  ;;  %v536_v52 = vpack.c.bf16 %v302_v50, %v298_v46  ;;  %v264_v53 = vpop.f32.mrb[11].mxu0  ;;  %v304_v54 = vpop.f32.mrb[11].mxu1 }
 0x131   :  { %402 = vst [vmem:[#allocation8 + $0x28] sm:$0xff] %v264_v53  ;;  %410 = vst [vmem:[#allocation8 + $0x68] sm:$0xff] %v304_v54 }
 0x132   :  { %544 = vst [vmem:[#allocation7 + $0x10] sm:$0xff] %v516_v51   ;;  %548 = vst [vmem:[#allocation7 + $0x30] sm:$0xff] %v536_v52  }
 0x135   :  { %v268_v55 = vpop.f32.mrb[12].mxu0  ;;  %v308_v56 = vpop.f32.mrb[12].mxu1 }
 0x136   :  { %v270_v57 = vpop.f32.mrb[13].mxu0  ;;  %v310_v58 = vpop.f32.mrb[13].mxu1 }
 0x137   :  { %403 = vst [vmem:[#allocation8 + $0x30] sm:$0xff] %v270_v57  ;;  %411 = vst [vmem:[#allocation8 + $0x70] sm:$0xff] %v310_v58  ;;  %v272_v59 = vpop.f32.mrb[14].mxu0  ;;  %v312_v60 = vpop.f32.mrb[14].mxu1 }
 0x138   :  { %v521_v61 = vpack.c.bf16 %v272_v59, %v268_v55  ;;  %v541_v62 = vpack.c.bf16 %v312_v60, %v308_v56  ;;  %v274_v63 = vpop.f32.mrb[15].mxu0  ;;  %v314_v0 = vpop.f32.mrb[15].mxu1 }
 0x139   :  { %404 = vst [vmem:[#allocation8 + $0x38] sm:$0xff] %v274_v63  ;;  %412 = vst [vmem:[#allocation8 + $0x78] sm:$0xff] %v314_v0 }
 0x13a   :  { %545 = vst [vmem:[#allocation7 + $0x18] sm:$0xff] %v521_v61   ;;  %549 = vst [vmem:[#allocation7 + $0x38] sm:$0xff] %v541_v62  }
 0x13b   :  { %662 = shalt.err (!%p659_p6)
}
 0x13c   :  { %s663_s18 = scalar_lea.hbm %s810_s3, 2048 }
 0x13d   :  { %p664_p7 = scmp.ne.s32.totalorder %s810_s3, %s663_s18  ;;  %p667_p8 = scmp.lt.u32.totalorder %s663_s18, %s810_s3 }
 0x13f   :  { %p669_p9 = pnand %p667_p8, %p664_p7 }
 0x141   :  { %672 = shalt.err (!%p669_p9)
}
 0x142   :  { %436 = dma.vmem_to_hbm [thread:$0]  %s431_s12, 2048, %s810_s3, [#allocation9], %s707_s0, %s707_s0, %s708_s9  }
 0x143   :  { %s673_s27 = scalar_lea.vmem %s770_s14, 1024  ;;  %p678_p11 = scmp.lt.s32.totalorder %s770_s14, %s770_s14 }
 0x144   :  { %p674_p10 = scmp.ne.s32.totalorder %s770_s14, %s673_s27  ;;  %p679_p12 = scmp.lt.s32.totalorder %s673_s27, %s673_s27 }
 0x146   :  { %p680_p13 = por %p679_p12, %p678_p11 }
 0x148   :  { %p681_p0 = pnand %p680_p13, %p674_p10 }
 0x14a   :  { %684 = shalt.err (!%p681_p0)
}
 0x14b   :  { %s685_s30 = scalar_lea.hbm %s809_s2, 1024 }
 0x14c   :  { %p686_p1 = scmp.ne.s32.totalorder %s809_s2, %s685_s30  ;;  %p689_p2 = scmp.lt.u32.totalorder %s685_s30, %s809_s2 }
 0x14e   :  { %p691_p3 = pnand %p689_p2, %p686_p1 }
 0x150   :  { %694 = shalt.err (!%p691_p3)
}
 0x151   :  { %424 = dma.vmem_to_hbm [thread:$0]  %s770_s14, 1024, %s809_s2, [#allocation4], %s704_s22, %s704_s22, %s705_s23  }
 0x152   :  { %699 = dma.done.wait [#allocation4], 1024  }
 0x153   :  { %700 = vsyncadd [#allocation4], 4294966272 }
 0x154   :  { %701 = dma.done.wait [#allocation9], 2048  }
 0x155   :  { %702 = vsyncadd [#allocation9], 4294965248 }
 0x156   :  { %443 = vsyncpa [#allocation3], 1 }
 0x157   :  { %444 = vsyncpa [#allocation6], 1 }
 0x158   :  { %445 = vsyncpa [#allocation4], 1 }
 0x159   :  { %446 = vsyncpa [#allocation9], 1 }

</bundles_post_ra>
